<compile_context>
chip_gen: v7x
topology: tpu7x:2x2x1
jax: 0.10.0
libtpu: 0.0.40
codegen_flags: <defaults>
</compile_context>

<pallas_src>
import math
import functools

import jax
import jax.numpy as jnp
from jax import lax
from jax.experimental import pallas as pl
from jax.experimental.pallas import tpu as pltpu

BN_EPS = 1e-5
LRELU_SLOPE = 0.01  # nn.LeakyReLU() default


# --------------------------------------------------------------------------- #
# Kernels
# --------------------------------------------------------------------------- #
def _egnnc_matmul_kernel(e_ref, x_ref, w_ref, y_ref, stats_ref,
                         *, tb, n, f_in, f_out):
    # Batched E_i @ X_i on the MXU (bf16 inputs, f32 accumulate).
    ex = jnp.einsum("bij,bjf->bif", e_ref[...], x_ref[...],
                    preferred_element_type=jnp.float32)           # (tb, N, F_in) f32
    # Merge (tb, N) -> rows (free leading-dim reshape) so the W matmul sees a
    # wide M dimension; bf16 operands keep the MXU at native rate.
    ex = ex.reshape(tb * n, f_in).astype(jnp.bfloat16)
    y = jnp.dot(ex, w_ref[...],
                preferred_element_type=jnp.float32)                # (tb*N, F_out) f32

    # Per-channel partial statistics for this batch block (combined in XLA).
    s = jnp.sum(y, axis=0, keepdims=True)                          # (1, F_out)
    sq = jnp.sum(y * y, axis=0, keepdims=True)                     # (1, F_out)
    stats_ref[...] = jnp.concatenate([s, sq], axis=0).reshape(1, 2, f_out)

    # Pre-BN activations round-trip HBM in bf16; final output stays f32.
    y_ref[...] = y.reshape(tb, n, f_out).astype(y_ref.dtype)


def _egnnc_norm_kernel(y_ref, scale_ref, shift_ref, o_ref):
    # Fused BN (folded into scale/shift) + LeakyReLU, purely mul-add + select.
    yn = y_ref[...].astype(jnp.float32) * scale_ref[...] + shift_ref[...]
    o_ref[...] = jnp.where(yn >= 0, yn, LRELU_SLOPE * yn)


# --------------------------------------------------------------------------- #
# Block-size / VMEM helpers
# --------------------------------------------------------------------------- #
def _vmem_limit_bytes():
    """~80% of physical VMEM (≈51 MiB on v7x, ≈102 MiB on v5e/v6e), or None."""
    try:
        info_fn = getattr(pltpu, "get_tpu_info", None)
        if info_fn is None:
            return None
        cap = getattr(info_fn(), "vmem_capacity_bytes", None)
        return int(cap * 0.8) if cap else None
    except Exception:
        return None


def _divisors(n):
    return [d for d in range(1, n + 1) if n % d == 0]


def _pick_batch_block(batch, per_item_bytes, budget):
    fitting = [d for d in _divisors(batch) if d * per_item_bytes <= budget]
    return max(fitting) if fitting else 1


def _pick_row_block(rows, row_bytes, budget):
    # (8,128) rule: block row count must be a multiple of 8 or span the array.
    cands = [d for d in _divisors(rows) if d % 8 == 0 or d == rows]
    fitting = [d for d in cands if d * row_bytes <= budget]
    return max(fitting) if fitting else min(cands)


# --------------------------------------------------------------------------- #
# Forward
# --------------------------------------------------------------------------- #
def egnnc_forward(X, E, W, bias=None):
    """X: (B, N, F_in), E: (B, N, N), W: (F_in, F_out), bias: (F_out,) or None.

    Training-mode BatchNorm1d (gamma=1, beta=0, batch statistics) immediately
    follows the affine map, so a per-channel bias is exactly cancelled by the
    mean subtraction; it is therefore not needed by the kernels.
    """
    del bias  # cancelled by the BN mean subtraction (training mode)
    B, N, F_in = X.shape
    F_out = W.shape[1]
    count = float(B * N)

    vmem_limit = _vmem_limit_bytes()
    budget = (vmem_limit or (32 << 20)) // 2  # leave headroom for double-buffering

    cparams = pltpu.CompilerParams(
        dimension_semantics=("parallel",),  # no carried state -> both TCs on v7x
        vmem_limit_bytes=vmem_limit,
    )

    # --------- pass A: Y = (E @ X) @ W  +  per-block channel stats ----------
    # Double-buffered per-graph VMEM footprint: E + X (bf16 in) + Y (bf16 out).
    per_graph = 2 * (N * N * 2 + N * F_in * 2 + N * F_out * 2)
    tb = _pick_batch_block(B, per_graph, budget)
    nb = B // tb

    matmul_kernel = functools.partial(
        _egnnc_matmul_kernel, tb=tb, n=N, f_in=F_in, f_out=F_out)

    y_hbm, stats = pl.pallas_call(
        matmul_kernel,
        grid=(nb,),
        in_specs=[
            pl.BlockSpec((tb, N, N), lambda b: (b, 0, 0)),       # E block
            pl.BlockSpec((tb, N, F_in), lambda b: (b, 0, 0)),    # X block
            pl.BlockSpec((F_in, F_out), lambda b: (0, 0)),       # W (resident)
        ],
        out_specs=[
            pl.BlockSpec((tb, N, F_out), lambda b: (b, 0, 0)),   # pre-BN Y (bf16)
            pl.BlockSpec((1, 2, F_out), lambda b: (b, 0, 0)),    # (sum, sumsq)
        ],
        out_shape=[
            jax.ShapeDtypeStruct((B, N, F_out), jnp.bfloat16),
            jax.ShapeDtypeStruct((nb, 2, F_out), jnp.float32),
        ],
        compiler_params=cparams,
    )(E.astype(jnp.bfloat16), X.astype(jnp.bfloat16), W.astype(jnp.bfloat16))

    # --------- tiny XLA glue: fold BN into per-channel scale/shift ----------
    col_sum = jnp.sum(stats[:, 0, :], axis=0)
    col_sq = jnp.sum(stats[:, 1, :], axis=0)
    mean = col_sum / count
    # E[y^2] - mean^2 can dip slightly negative from f32 cancellation; clamp.
    var = jnp.maximum(col_sq / count - mean * mean, 0.0)  # biased (training BN)
    scale = lax.rsqrt(var + BN_EPS)                        # gamma = 1
    shift = -mean * scale                                  # beta = 0

    # --------- pass B: y*scale + shift, LeakyReLU (lane-dense blocks) -------
    if (N * F_out) % 128 == 0:
        # Flatten (N, F_out) onto the lane axis -> unmasked full-width stores.
        y_view = y_hbm.reshape(B, N * F_out)
        scale_v = jnp.tile(scale, N)[None, :]
        shift_v = jnp.tile(shift, N)[None, :]
    else:
        y_view = y_hbm.reshape(B * N, F_out)
        scale_v = scale[None, :]
        shift_v = shift[None, :]
    rows, cols = y_view.shape
    row_bytes = 2 * cols * 2 + 2 * cols * 4  # double-buffered bf16 in + f32 out
    r = _pick_row_block(rows, row_bytes, budget)

    out = pl.pallas_call(
        _egnnc_norm_kernel,
        grid=(rows // r,),
        in_specs=[
            pl.BlockSpec((r, cols), lambda i: (i, 0)),
            pl.BlockSpec((1, cols), lambda i: (0, 0)),
            pl.BlockSpec((1, cols), lambda i: (0, 0)),
        ],
        out_specs=pl.BlockSpec((r, cols), lambda i: (i, 0)),
        out_shape=jax.ShapeDtypeStruct((rows, cols), jnp.float32),
        compiler_params=cparams,
    )(y_view, scale_v, shift_v)

    return out.reshape(B, N, F_out)


# --------------------------------------------------------------------------- #
# Pure-JAX reference (mirrors the PyTorch module, training-mode BN)
# --------------------------------------------------------------------------- #
def egnnc_reference(X, E, W, bias):
    EX = jnp.einsum("bij,bjf->bif", E, X)
    Y = jnp.einsum("bnf,fo->bno", EX, W) + bias
    mean = jnp.mean(Y, axis=(0, 1), keepdims=True)
    var = jnp.mean((Y - mean) ** 2, axis=(0, 1), keepdims=True)
    Yn = (Y - mean) / jnp.sqrt(var + BN_EPS)
    return jnp.where(Yn >= 0, Yn, LRELU_SLOPE * Yn)


if __name__ == "__main__":
    # small, module-consistent shapes
    B, N = 2, 16
    in_features, out_features = 16, 32

    key = jax.random.PRNGKey(0)
    kx, ke, kw, kb = jax.random.split(key, 4)

    X = jax.random.normal(kx, (B, N, in_features), dtype=jnp.float32)
    E = jax.random.normal(ke, (B, N, N), dtype=jnp.float32)

    # deterministic parameter init matching reset_parameters(): U(-stdv, stdv)
    stdv = 1.0 / math.sqrt(out_features)
    W = jax.random.uniform(kw, (in_features, out_features),
                           minval=-stdv, maxval=stdv, dtype=jnp.float32)
    bias = jax.random.uniform(kb, (out_features,),
                              minval=-stdv, maxval=stdv, dtype=jnp.float32)
    # BatchNorm1d affine params default to gamma=1, beta=0 -> identity after norm.

    out = egnnc_forward(X, E, W, bias)
    out = jax.block_until_ready(out)

    ref = egnnc_reference(X, E, W, bias)
    assert out.shape == (B, N, out_features)
    err = float(jnp.max(jnp.abs(out - ref)))
    assert err < 5e-2, f"max abs err {err}"

    print("KERNEL_OK")
</pallas_src>

<mosaic_0001>
module attributes {stable_mosaic.version = 11 : i64} {
  func.func @_egnnc_matmul_kernel(%arg0: i32, %arg1: memref<2x16x16xbf16, #tpu.memory_space<vmem>>, %arg2: memref<2x16x16xbf16, #tpu.memory_space<vmem>>, %arg3: memref<16x32xbf16, #tpu.memory_space<vmem>>, %arg4: memref<2x16x32xbf16, #tpu.memory_space<vmem>>, %arg5: memref<1x2x32xf32, #tpu.memory_space<vmem>>) attributes {dimension_semantics = [#tpu.dimension_semantics<parallel>], iteration_bounds = array<i64: 1>, scalar_prefetch = 0 : i64, scratch_operands = 0 : i64, tpu.core_type = #tpu.core_type<tc>, window_params = [{transform_indices = @transform_0, window_bounds = array<i64: 2, 16, 16>}, {transform_indices = @transform_1, window_bounds = array<i64: 2, 16, 16>}, {pipeline_mode = #tpu.pipeline_mode<synchronous>, transform_indices = @transform_2, window_bounds = array<i64: 16, 32>}, {transform_indices = @transform_3, window_bounds = array<i64: 2, 16, 32>}, {transform_indices = @transform_4, window_bounds = array<i64: 1, 2, 32>}]} {
    %c0 = arith.constant 0 : index
    %c0_0 = arith.constant 0 : index
    %c0_1 = arith.constant 0 : index
    %0 = vector.load %arg1[%c0, %c0_0, %c0_1] : memref<2x16x16xbf16, #tpu.memory_space<vmem>>, vector<2x16x16xbf16>
    %c0_2 = arith.constant 0 : index
    %c0_3 = arith.constant 0 : index
    %c0_4 = arith.constant 0 : index
    %1 = vector.load %arg2[%c0_2, %c0_3, %c0_4] : memref<2x16x16xbf16, #tpu.memory_space<vmem>>, vector<2x16x16xbf16>
    "tpu.trace_start"() <{level = 10 : i32, message = "bij,bjf->bif"}> : () -> ()
    %cst = arith.constant dense<0.000000e+00> : vector<2x16x16xf32>
    %2 = tpu.matmul %0, %1, %cst {dimension_numbers = #tpu.dot_dimension_numbers<[2], [1], [1], [2], [0, 0, 0, 1, 1, 2], [0], [0]>} : vector<2x16x16xbf16>, vector<2x16x16xbf16>, vector<2x16x16xf32> -> vector<2x16x16xf32>
    "tpu.trace_stop"() : () -> ()
    %3 = vector.shape_cast %2 : vector<2x16x16xf32> to vector<32x16xf32>
    %4 = arith.truncf %3 : vector<32x16xf32> to vector<32x16xbf16>
    %c0_5 = arith.constant 0 : index
    %c0_6 = arith.constant 0 : index
    %5 = vector.load %arg3[%c0_5, %c0_6] : memref<16x32xbf16, #tpu.memory_space<vmem>>, vector<16x32xbf16>
    %cst_7 = arith.constant dense<0.000000e+00> : vector<32x32xf32>
    %6 = tpu.matmul %4, %5, %cst_7 {dimension_numbers = #tpu.dot_dimension_numbers<[1], [0], [0], [1], [0, 0, 1, 1], [], []>} : vector<32x16xbf16>, vector<16x32xbf16>, vector<32x32xf32> -> vector<32x32xf32>
    %cst_8 = arith.constant dense<0.000000e+00> : vector<32xf32>
    %7 = vector.multi_reduction <add>, %6, %cst_8 [0] : vector<32x32xf32> to vector<32xf32>
    %8 = vector.shape_cast %7 : vector<32xf32> to vector<1x32xf32>
    %9 = arith.mulf %6, %6 : vector<32x32xf32>
    %cst_9 = arith.constant dense<0.000000e+00> : vector<32xf32>
    %10 = vector.multi_reduction <add>, %9, %cst_9 [0] : vector<32x32xf32> to vector<32xf32>
    %11 = vector.shape_cast %10 : vector<32xf32> to vector<1x32xf32>
    %12 = tpu.concatenate %8, %11 in 0 : vector<1x32xf32>, vector<1x32xf32> -> vector<2x32xf32>
    %13 = vector.shape_cast %12 : vector<2x32xf32> to vector<1x2x32xf32>
    %c0_10 = arith.constant 0 : index
    %c0_11 = arith.constant 0 : index
    %c0_12 = arith.constant 0 : index
    %14 = vector.load %arg5[%c0_10, %c0_11, %c0_12] : memref<1x2x32xf32, #tpu.memory_space<vmem>>, vector<1x2x32xf32>
    tpu.vector_store %arg5[%c0_10, %c0_11, %c0_12], %13 {strides = array<i32>} : memref<1x2x32xf32, #tpu.memory_space<vmem>>, vector<1x2x32xf32>,
    %15 = vector.shape_cast %6 : vector<32x32xf32> to vector<2x16x32xf32>
    %16 = arith.truncf %15 : vector<2x16x32xf32> to vector<2x16x32xbf16>
    %c0_13 = arith.constant 0 : index
    %c0_14 = arith.constant 0 : index
    %c0_15 = arith.constant 0 : index
    %17 = vector.load %arg4[%c0_13, %c0_14, %c0_15] : memref<2x16x32xbf16, #tpu.memory_space<vmem>>, vector<2x16x32xbf16>
    tpu.vector_store %arg4[%c0_13, %c0_14, %c0_15], %16 {strides = array<i32>} : memref<2x16x32xbf16, #tpu.memory_space<vmem>>, vector<2x16x32xbf16>,
    return
  }
  func.func @transform_0(%arg0: i32) -> (i32, i32, i32) {
    %c0_i32 = arith.constant 0 : i32
    %c0_i32_0 = arith.constant 0 : i32
    %c0_i32_1 = arith.constant 0 : i32
    return %arg0, %c0_i32, %c0_i32_0 : i32, i32, i32
  }
  func.func @transform_1(%arg0: i32) -> (i32, i32, i32) {
    %c0_i32 = arith.constant 0 : i32
    %c0_i32_0 = arith.constant 0 : i32
    %c0_i32_1 = arith.constant 0 : i32
    return %arg0, %c0_i32, %c0_i32_0 : i32, i32, i32
  }
  func.func @transform_2(%arg0: i32) -> (i32, i32) {
    %c0_i32 = arith.constant 0 : i32
    %c0_i32_0 = arith.constant 0 : i32
    %c0_i32_1 = arith.constant 0 : i32
    return %c0_i32, %c0_i32_0 : i32, i32
  }
  func.func @transform_3(%arg0: i32) -> (i32, i32, i32) {
    %c0_i32 = arith.constant 0 : i32
    %c0_i32_0 = arith.constant 0 : i32
    %c0_i32_1 = arith.constant 0 : i32
    return %arg0, %c0_i32, %c0_i32_0 : i32, i32, i32
  }
  func.func @transform_4(%arg0: i32) -> (i32, i32, i32) {
    %c0_i32 = arith.constant 0 : i32
    %c0_i32_0 = arith.constant 0 : i32
    %c0_i32_1 = arith.constant 0 : i32
    return %arg0, %c0_i32, %c0_i32_0 : i32, i32, i32
  }
}

</mosaic_0001>

<bundles_post_ra>
// kernel: tpu_custom_call.1
= control target key start
LH: loop header
LB: loop body
LE: loop exit
PB: predicated region body
PF: predicated region fallthrough
CT: control target
= control target key end

     0   :  { %10 = vsyncpa [#allocation3], 0  ;;  %s635_s0 = inlined_call_operand.hbm [shape: bf16[2,16,16], index: 0, kind: input, shape index: {}]   ;;  %s636_s1 = inlined_call_operand.hbm [shape: bf16[2,16,16], index: 1, kind: input, shape index: {}]   ;;  %s637_s2 = inlined_call_operand.hbm [shape: bf16[16,32], index: 2, kind: input, shape index: {}]   ;;  %s638_s3 = inlined_call_operand.hbm [shape: bf16[2,16,32], index: 3, kind: output, shape index: {0}]   ;;  %s639_s4 = inlined_call_operand.hbm [shape: f32[1,2,32], index: 4, kind: output, shape index: {1}]  }
   0x1   :  { %11 = vsyncpa [#allocation6], 0 }
   0x2   :  { %12 = vsyncpa [#allocation4], 0 }
   0x3   :  { %13 = vsyncpa [#allocation10], 0  ;;  %s506_s15 = smov [#allocation5]   ;;  %s507_s17 = smov [#allocation2]  }
   0x4   :  { %s31_s16 = sshll.u32 %s506_s15, 4  ;;  %s19_s18 = sshll.u32 %s507_s17, 4  ;;  %s32_s16 = int_to_ptr.vmem [resolvable:$true] %s31_s16  ;;  %s540_s18 = int_to_ptr.vmem [resolvable:$true] %s19_s18 }
   0x5   :  { %s388_s21 = scalar_lea.hbm %s636_s1, 256 }
   0x6   :  { %p389_p0 = scmp.ne.s32.totalorder %s636_s1, %s388_s21  ;;  %p392_p1 = scmp.lt.u32.totalorder %s388_s21, %s636_s1 }
   0x8   :  { %p394_p2 = pnand %p392_p1, %p389_p0 }
   0xa   :  { %397 = shalt.err (!%p394_p2)
}
   0xb   :  { %s398_s26 = scalar_lea.vmem %s32_s16, 256  ;;  %p403_p4 = scmp.lt.s32.totalorder %s32_s16, %s32_s16 }
   0xc   :  { %p399_p3 = scmp.ne.s32.totalorder %s32_s16, %s398_s26  ;;  %p404_p5 = scmp.lt.s32.totalorder %s398_s26, %s398_s26 }
   0xe   :  { %p405_p6 = por %p404_p5, %p403_p4 }
  0x10   :  { %p406_p7 = pnand %p405_p6, %p399_p3 }
  0x12   :  { %409 = shalt.err (!%p406_p7)
}
  0x13   :  { %s508_s27 = smov 64   ;;  %s509_s28 = smov 4  }
  0x14   :  { %37 = dma.hbm_to_vmem [thread:$0]  %s636_s1, 256, %s32_s16, [#allocation6], %s508_s27, %s508_s27, %s509_s28  }
  0x15   :  { %s410_s7 = scalar_lea.hbm %s635_s0, 256 }
  0x16   :  { %p411_p8 = scmp.ne.s32.totalorder %s635_s0, %s410_s7  ;;  %p414_p9 = scmp.lt.u32.totalorder %s410_s7, %s635_s0 }
  0x18   :  { %p416_p10 = pnand %p414_p9, %p411_p8 }
  0x1a   :  { %419 = shalt.err (!%p416_p10)
}
  0x1b   :  { %s420_s12 = scalar_lea.vmem %s540_s18, 256  ;;  %p425_p12 = scmp.lt.s32.totalorder %s540_s18, %s540_s18 }
  0x1c   :  { %p421_p11 = scmp.ne.s32.totalorder %s540_s18, %s420_s12  ;;  %p426_p13 = scmp.lt.s32.totalorder %s420_s12, %s420_s12 }
  0x1e   :  { %p427_p0 = por %p426_p13, %p425_p12 }
  0x20   :  { %p428_p1 = pnand %p427_p0, %p421_p11 }
  0x22   :  { %431 = shalt.err (!%p428_p1)
}
  0x23   :  { %25 = dma.hbm_to_vmem [thread:$0]  %s635_s0, 256, %s540_s18, [#allocation3], %s508_s27, %s508_s27, %s509_s28  }
  0x24   :  { %s510_s14 = smov [#allocation7]   ;;  %s432_s19 = scalar_lea.hbm %s637_s2, 128 }
  0x25   :  { %s43_s15 = sshll.u32 %s510_s14, 4  ;;  %p433_p2 = scmp.ne.s32.totalorder %s637_s2, %s432_s19  ;;  %s44_s15 = int_to_ptr.vmem [resolvable:$true] %s43_s15 }
  0x26   :  { %p436_p3 = scmp.lt.u32.totalorder %s432_s19, %s637_s2 }
  0x28   :  { %p438_p4 = pnand %p436_p3, %p433_p2 }
  0x2a   :  { %441 = shalt.err (!%p438_p4)
}
  0x2b   :  { %s442_s24 = scalar_lea.vmem %s44_s15, 128  ;;  %p447_p6 = scmp.lt.s32.totalorder %s44_s15, %s44_s15 }
  0x2c   :  { %p443_p5 = scmp.ne.s32.totalorder %s44_s15, %s442_s24  ;;  %p448_p7 = scmp.lt.s32.totalorder %s442_s24, %s442_s24 }
  0x2e   :  { %p449_p8 = por %p448_p7, %p447_p6 }
  0x30   :  { %p450_p9 = pnand %p449_p8, %p443_p5 }
  0x32   :  { %453 = shalt.err (!%p450_p9)
}
  0x33   :  { %49 = dma.hbm_to_vmem [thread:$0]  %s637_s2, 128, %s44_s15, [#allocation6], %s508_s27, %s508_s27, %s509_s28  }
  0x34   :  { %498 = dma.done.wait [#allocation3], 256  }
  0x35   :  { %499 = vsyncadd [#allocation3], 4294967040 }
  0x36   :  { %500 = dma.done.wait [#allocation6], 384  }
  0x37   :  { %501 = vsyncadd [#allocation6], 4294966912  ;;  %v511_v0 = vmov 0.0   ;;  %vm512_vm0 = vmmov 0   ;;  %v383_v1 = vld [vmem:[#allocation5] sm:$0xff]   ;;  %v384_v2 = vld [vmem:[#allocation5 + $0x8] sm:$0xff]  }
  0x38   :  { %356 = vmatprep.subr.bf16.mxu0 %v511_v0  ;;  %362 = vmatprep.subr.bf16.mxu1 %v511_v0  ;;  %v385_v3 = vld [vmem:[#allocation2] sm:$0xff]   ;;  %vm79_vm1 = vcmask 130048   ;;  %v386_v4 = vld [vmem:[#allocation2 + $0x8] sm:$0xff]   ;;  %vm295_vm2 = vcmask 257024   ;;  %vm244_vm3 = vcmask 261120   ;;  %s513_s2 = smov [#allocation8]  }
  0x39   :  { %358 = vmatprep.mubr.msk.bf16.mxu0 %vm512_vm0, %v511_v0  ;;  %364 = vmatprep.mubr.msk.bf16.mxu1 %vm512_vm0, %v511_v0  ;;  %v387_v5 = vld [vmem:[#allocation7] sm:$0xff]   ;;  %s305_s25 = sshll.u32 %s513_s2, 4  ;;  %s306_s25 = int_to_ptr.vmem [resolvable:$true] %s305_s25 }
  0x3a   :  { %357 = vmatpush3.bf16.msra.mxu0 %v383_v1  ;;  %363 = vmatpush3.bf16.msra.mxu1 %v384_v2  ;;  %s454_s26 = scalar_lea.vmem %s306_s25, 256  ;;  %p459_p11 = scmp.lt.s32.totalorder %s306_s25, %s306_s25 }
  0x3b   :  { %368 = vmatprep.subr.bf16.mxu0 %v387_v5  ;;  %p455_p10 = scmp.ne.s32.totalorder %s306_s25, %s454_s26  ;;  %p460_p12 = scmp.lt.s32.totalorder %s454_s26, %s454_s26 }
  0x3d   :  { %359 = vmatmul.mubr.msk.bf16.vlgmr.msra.gmra.mrb[0].mxu0 %vm79_vm1, %v385_v3  ;;  %365 = vmatmul.mubr.msk.bf16.vlgmr.msra.gmra.mrb[0].mxu1 %vm79_vm1, %v386_v4  ;;  %p461_p13 = por %p460_p12, %p459_p11 }
  0x3e   :  { %369 = vmatpush3.bf16.msra.mxu0 %v387_v5 }
  0x3f   :  { %p462_p0 = pnand %p461_p13, %p455_p10 }
 0x110   :  { %v117_v6 = vpop.f32.mrb[0].mxu0  ;;  %v172_v7 = vpop.f32.mrb[0].mxu1 }
 0x111   :  { %v360_v8 = vpop.f32.mrb[1].mxu0  ;;  %v366_v9 = vpop.f32.mrb[1].mxu1 }
 0x112   :  { %v120_v10 = vpop.f32.mrb[2].mxu0  ;;  %v175_v12 = vpop.f32.mrb[2].mxu1 }
 0x113   :  { %v179_v11 = vpack.c.bf16 %v120_v10, %v117_v6  ;;  %v361_v13 = vpop.f32.mrb[3].mxu0  ;;  %v180_v14 = vpack.c.bf16 %v175_v12, %v172_v7  ;;  %v367_v15 = vpop.f32.mrb[3].mxu1 }
 0x115   :  { %370 = vmatprep.mubr.msk.bf16.mxu0 %vm79_vm1, %v179_v11 }
 0x116   :  { %371 = vmatmul.mubr.msk.bf16.vlgmr.msra.gmra.mrb[4].mxu0 %vm79_vm1, %v180_v14 }
 0x1e9   :  { %v372_v16 = vpop.f32.mrb[4].mxu0 }
 0x1ea   :  { %v347_v17 = vpack.c.bf16 %v372_v16, %v372_v16  ;;  %v229_v18 = vpop.f32.mrb[5].mxu0  ;;  %v260_v22 = vmul.f32 %v372_v16, %v372_v16  ;;  %v248_v30 = vsel %vm244_vm3, %v372_v16, 0.0 }
 0x1eb   :  { %v258_v19 = vmul.f32 %v229_v18, %v229_v18  ;;  %v345_v20 = vpack.c.bf16 %v229_v18, %v229_v18  ;;  %v373_v21 = vpop.f32.mrb[6].mxu0  ;;  %v245_v25 = vsel %vm244_vm3, %v229_v18, 0.0 }
 0x1ec   :  { %298 = vst.msk [vmem:[#allocation8 + $0x8] sm:$0xf] %vm295_vm2, %v347_v17  ;;  %v348_v23 = vpack.c.bf16 %v373_v21, %v373_v21  ;;  %v232_v24 = vpop.f32.mrb[7].mxu0  ;;  %v261_v32 = vmul.f32 %v373_v21, %v373_v21 }
 0x1ed   :  { %296 = vst.msk [vmem:[#allocation8] sm:$0xf] %vm295_vm2, %v345_v20  ;;  %v246_v26 = vsel %vm244_vm3, %v232_v24, 0.0  ;;  %v259_v27 = vmul.f32 %v232_v24, %v232_v24  ;;  %v346_v28 = vpack.c.bf16 %v232_v24, %v232_v24  ;;  %v262_v31 = vsel %vm244_vm3, %v258_v19, 0.0 }
 0x1ee   :  { %299 = vst.msk [vmem:[#allocation8 + $0xc] sm:$0xf] %vm295_vm2, %v348_v23  ;;  %v247_v29 = vadd.f32 %v246_v26, %v245_v25 }
 0x1ef   :  { %v263_v33 = vsel %vm244_vm3, %v259_v27, 0.0  ;;  %297 = vst.msk [vmem:[#allocation8 + $0x4] sm:$0xf] %vm295_vm2, %v346_v28 }
 0x1f0   :  { %v249_v34 = vadd.f32 %v248_v30, %v247_v29  ;;  %v264_v35 = vadd.f32 %v263_v33, %v262_v31 }
 0x1f1   :  { %465 = shalt.err (!%p462_p0)
}
 0x1f2   :  { %s466_s5 = scalar_lea.hbm %s638_s3, 256 }
 0x1f3   :  { %p467_p1 = scmp.ne.s32.totalorder %s638_s3, %s466_s5  ;;  %p470_p2 = scmp.lt.u32.totalorder %s466_s5, %s638_s3 }
 0x1f5   :  { %p472_p3 = pnand %p470_p2, %p467_p1 }
 0x1f7   :  { %475 = shalt.err (!%p472_p3)
}
 0x1f8   :  { %311 = dma.vmem_to_hbm [thread:$0]  %s306_s25, 256, %s638_s3, [#allocation4], %s508_s27, %s508_s27, %s509_s28   ;;  %v265_v36 = vsel %vm244_vm3, %v260_v22, 0.0  ;;  %v250_v37 = vsel %vm244_vm3, %v373_v21, 0.0  ;;  %v267_v40 = vsel %vm244_vm3, %v261_v32, 0.0  ;;  %vm275_vm4 = vcmask 1040384  }
 0x1f9   :  { %v251_v38 = vadd.f32 %v250_v37, %v249_v34  ;;  %v266_v39 = vadd.f32 %v265_v36, %v264_v35  ;;  %s514_s3 = smov [#allocation9]   ;;  %vm277_vm5 = vcmask 254976  }
 0x1fa   :  { %s318_s27 = sshll.u32 %s514_s3, 4  ;;  %s319_s27 = int_to_ptr.vmem [resolvable:$true] %s318_s27 }
 0x1fb   :  { %v252_v41 = vrot.slane %v251_v38, 4  ;;  %v268_v42 = vadd.f32 %v267_v40, %v266_v39  ;;  %s476_s28 = scalar_lea.vmem %s319_s27, 32  ;;  %p481_p5 = scmp.lt.s32.totalorder %s319_s27, %s319_s27 }
 0x1fc   :  { %p477_p4 = scmp.ne.s32.totalorder %s319_s27, %s476_s28  ;;  %p482_p6 = scmp.lt.s32.totalorder %s476_s28, %s476_s28 }
 0x1fd   :  { %v253_v43 = vadd.f32 %v252_v41, %v251_v38  ;;  %v269_v44 = vrot.slane %v268_v42, 4 }
 0x1fe   :  { %p483_p7 = por %p482_p6, %p481_p5 }
 0x1ff   :  { %v254_v45 = vrot.slane %v253_v43, 2  ;;  %v270_v46 = vadd.f32 %v269_v44, %v268_v42 }
 0x200   :  { %p484_p8 = pnand %p483_p7, %p477_p4 }
 0x201   :  { %v255_v47 = vadd.f32 %v254_v45, %v253_v43  ;;  %v271_v48 = vrot.slane %v270_v46, 2 }
 0x203   :  { %v256_v49 = vrot.slane %v255_v47, 1  ;;  %v272_v50 = vadd.f32 %v271_v48, %v270_v46 }
 0x205   :  { %v273_v51 = vrot.slane %v272_v50, 1  ;;  %v257_v52 = vadd.f32 %v256_v49, %v255_v47 }
 0x207   :  { %v274_v53 = vadd.f32 %v273_v51, %v272_v50 }
 0x209   :  { %v276_v54 = vsel %vm275_vm4, %v257_v52, %v274_v53 }
 0x20a   :  { %278 = vst.msk [vmem:[#allocation9] sm:$0x3] %vm277_vm5, %v276_v54 }
 0x20b   :  { %487 = shalt.err (!%p484_p8)
}
 0x20c   :  { %s488_s13 = scalar_lea.hbm %s639_s4, 32 }
 0x20d   :  { %p489_p9 = scmp.ne.s32.totalorder %s639_s4, %s488_s13  ;;  %p492_p10 = scmp.lt.u32.totalorder %s488_s13, %s639_s4 }
 0x20f   :  { %p494_p11 = pnand %p492_p10, %p489_p9 }
 0x211   :  { %497 = shalt.err (!%p494_p11)
}
 0x212   :  { %321 = dma.vmem_to_hbm [thread:$0]  %s319_s27, 32, %s639_s4, [#allocation10]  }
 0x213   :  { %502 = dma.done.wait [#allocation4], 256  }
 0x214   :  { %503 = vsyncadd [#allocation4], 4294967040 }
 0x215   :  { %504 = dma.done.wait [#allocation10], 32  }
 0x216   :  { %505 = vsyncadd [#allocation10], 4294967264 }
 0x217   :  { %328 = vsyncpa [#allocation3], 1 }
 0x218   :  { %329 = vsyncpa [#allocation6], 1 }
 0x219   :  { %330 = vsyncpa [#allocation4], 1 }
 0x21a   :  { %331 = vsyncpa [#allocation10], 1 }

</bundles_post_ra>
